<compile_context>
chip_gen: v7x
topology: tpu7x:2x2x1
jax: 0.10.0
libtpu: 0.0.40
codegen_flags: <defaults>
</compile_context>

<pallas_src>
import functools
import math

import jax
import jax.numpy as jnp
from jax import lax
from jax.experimental import pallas as pl
from jax.experimental.pallas import tpu as pltpu

BN_EPS = 1e-5            # PyTorch BatchNorm1d default eps
NEG_INF = -1e30          # shift for padded clusters -> softmax weight 0
LANE = 128
VMEM_LIMIT = 32 * 1024 * 1024    # scoped VMEM cap (safe on v5e/v6e/v7x)
TILE_BUDGET = 16 * 1024 * 1024   # target per-grid-step working set (bytes)


def _use_bf16_exp():
    """bf16 EUP exp only on v6e / v7x (v5e has no bf16 EUP)."""
    try:
        kind = jax.devices()[0].device_kind.lower()
    except Exception:
        return False
    return ("v6" in kind) or ("v7" in kind)


def _pick_sample_tile(n, d, kp, budget_bytes):
    """Sample-axis (lane) tile size and required zero padding of N.

    Working set per sample column: double-buffered f32 x column (2*d*4 bytes)
    plus ~4 f32 activation temporaries of width kp.
    """
    per_sample = 2 * d * 4 + 4 * kp * 4
    cap = max(LANE, budget_bytes // per_sample)
    if n <= cap:
        return n, 0                         # one tile per batch (block dim == full dim)
    t = (cap // LANE) * LANE
    while t >= LANE:                        # largest 128-multiple divisor of n <= cap
        if n % t == 0:
            return t, 0
        t -= LANE
    tile = (cap // LANE) * LANE             # no aligned divisor: pad N with zero samples
    return tile, (-n) % tile


# ---------------------------------------------------------------------------
# phase 1: per-batch partial BN statistics of activation = x^T @ W
# ---------------------------------------------------------------------------
def _bn_stats_kernel(x_ref, w_ref, stat_ref):
    """x_ref: (1, D, tn) f32   w_ref: (D, Kp) bf16
    stat_ref (resident across the N axis): (1, 2, Kp) f32 -> [sum, sumsq]."""
    ni = pl.program_id(1)

    x = x_ref[0].astype(jnp.bfloat16)                       # (D, tn), cast on VPU
    # activation (tn, Kp): contract over D (both operands carry D on dim 0)
    act = lax.dot_general(
        x, w_ref[...],
        dimension_numbers=(((0,), (0,)), ((), ())),
        preferred_element_type=jnp.float32,
    )
    s = jnp.sum(act, axis=0, keepdims=True)[None]           # (1, 1, Kp)
    sq = jnp.sum(act * act, axis=0, keepdims=True)[None]    # (1, 1, Kp)

    @pl.when(ni == 0)
    def _first():
        stat_ref[:, 0:1, :] = s
        stat_ref[:, 1:2, :] = sq

    @pl.when(ni != 0)
    def _accum():
        stat_ref[:, 0:1, :] += s
        stat_ref[:, 1:2, :] += sq


# ---------------------------------------------------------------------------
# phase 2: matmul (scale pre-folded into W) + shift + softmax + x @ assign
# ---------------------------------------------------------------------------
def _vlad_kernel(x_ref, w_ref, shift_ref, out_ref, *, use_bf16_exp):
    """x_ref: (1, D, tn) f32   w_ref: (D, Kp) bf16 (BN scale folded in)
    shift_ref: (1, Kp) f32     out_ref (resident across N axis): (1, D, Kp) f32."""
    ni = pl.program_id(1)

    x = x_ref[0].astype(jnp.bfloat16)                       # (D, tn)
    act = lax.dot_general(
        x, w_ref[...],
        dimension_numbers=(((0,), (0,)), ((), ())),
        preferred_element_type=jnp.float32,
    )                                                       # (tn, Kp)
    act = act + shift_ref[...]                              # fused BatchNorm shift

    # softmax over clusters; exp on the EUP (bf16 on v6e/v7x), approx reciprocal
    m = jnp.max(act, axis=-1, keepdims=True)
    z = act - m
    if use_bf16_exp:
        e = jnp.exp(z.astype(jnp.bfloat16)).astype(jnp.float32)
    else:
        e = jnp.exp(z)
    denom = jnp.sum(e, axis=-1, keepdims=True)
    assign = (e * pl.reciprocal(denom, approx=True)).astype(jnp.bfloat16)

    # vlad contribution directly in output layout: (D, tn) @ (tn, Kp) -> (D, Kp)
    contrib = jnp.dot(x, assign, preferred_element_type=jnp.float32)

    @pl.when(ni == 0)
    def _first():
        out_ref[...] = contrib[None]

    @pl.when(ni != 0)
    def _accum():
        out_ref[...] += contrib[None]


# ---------------------------------------------------------------------------
# wrapper
# ---------------------------------------------------------------------------
def netvlad_loupe_gem(x_nchw, cluster_weights, bn_gamma, bn_beta):
    """x_nchw: (B, C, H, W); returns (B, feature_size, cluster_size)."""
    b, c, h, w = x_nchw.shape
    d = c                          # feature_size
    n = h * w                      # max_samples
    m_total = b * n
    k = cluster_weights.shape[1]   # cluster_size
    kp = ((k + LANE - 1) // LANE) * LANE

    # free reshape (contiguous), NO transpose / cast pre-pass over x
    x3 = x_nchw.reshape(b, d, n)

    tn, pad_n = _pick_sample_tile(n, d, kp, TILE_BUDGET)
    if pad_n:
        # zero samples contribute 0 to BN sums and 0 to x @ assign
        x3 = jnp.pad(x3, ((0, 0), (0, 0), (0, pad_n)))
    n_blocks = (n + pad_n) // tn

    # padded cluster columns stay exactly zero in W; padded gamma=0, beta=-1e30
    w_f32 = jnp.zeros((d, kp), jnp.float32).at[:, :k].set(
        cluster_weights.astype(jnp.float32))
    w_bf16 = w_f32.astype(jnp.bfloat16)
    gamma_p = jnp.zeros((kp,), jnp.float32).at[:k].set(bn_gamma.astype(jnp.float32))
    beta_p = jnp.full((kp,), NEG_INF, jnp.float32).at[:k].set(
        bn_beta.astype(jnp.float32))

    # ---------------- phase 1: per-batch partial BN statistics ----------------
    partial = pl.pallas_call(
        _bn_stats_kernel,
        out_shape=jax.ShapeDtypeStruct((b, 2, kp), jnp.float32),
        grid_spec=pltpu.PrefetchScalarGridSpec(
            num_scalar_prefetch=0,
            grid=(b, n_blocks),
            in_specs=[
                pl.BlockSpec((1, d, tn), lambda bi, ni: (bi, 0, ni)),
                pl.BlockSpec((d, kp), lambda bi, ni: (0, 0)),
            ],
            out_specs=pl.BlockSpec((1, 2, kp), lambda bi, ni: (bi, 0, 0)),
        ),
        compiler_params=pltpu.CompilerParams(
            dimension_semantics=("parallel", "arbitrary"),
            vmem_limit_bytes=VMEM_LIMIT,
        ),
        cost_estimate=pl.CostEstimate(
            flops=2 * m_total * d * kp + 3 * m_total * kp,
            transcendentals=0,
            bytes_accessed=m_total * d * 4 + d * kp * 2 + b * 2 * kp * 4,
        ),
    )(x3, w_bf16)

    # tiny (Kp-sized) merge + finalize in the wrapper; fold scale into W
    # TODO(synk): for very large B*N switch to chunk-centered (Welford-merge)
    # partial sums to avoid E[x^2]-mean^2 cancellation.
    sums = jnp.sum(partial, axis=0)                                  # (2, kp)
    inv_count = 1.0 / float(m_total)
    mean = sums[0] * inv_count
    var = jnp.maximum(sums[1] * inv_count - mean * mean, 0.0)        # biased var
    scale = gamma_p * lax.rsqrt(var + BN_EPS)
    shift = (beta_p - mean * scale)[None, :]                         # (1, kp)
    w_scaled = (w_f32 * scale[None, :]).astype(jnp.bfloat16)

    # ---------------- phase 2: shift + softmax + vlad ----------------
    out_p = pl.pallas_call(
        functools.partial(_vlad_kernel, use_bf16_exp=_use_bf16_exp()),
        out_shape=jax.ShapeDtypeStruct((b, d, kp), jnp.float32),
        grid_spec=pltpu.PrefetchScalarGridSpec(
            num_scalar_prefetch=0,
            grid=(b, n_blocks),
            in_specs=[
                pl.BlockSpec((1, d, tn), lambda bi, ni: (bi, 0, ni)),
                pl.BlockSpec((d, kp), lambda bi, ni: (0, 0)),
                pl.BlockSpec((1, kp), lambda bi, ni: (0, 0)),
            ],
            out_specs=pl.BlockSpec((1, d, kp), lambda bi, ni: (bi, 0, 0)),
        ),
        compiler_params=pltpu.CompilerParams(
            dimension_semantics=("parallel", "arbitrary"),
            vmem_limit_bytes=VMEM_LIMIT,
        ),
        cost_estimate=pl.CostEstimate(
            flops=4 * m_total * d * kp + 8 * m_total * kp,
            transcendentals=m_total * kp + m_total,
            bytes_accessed=m_total * d * 4 + d * kp * 2 + kp * 4 + b * d * kp * 4,
        ),
    )(x3, w_scaled, shift)

    if k == kp:
        return out_p
    # drop padded clusters -> (B, D, K), already in the torch output layout
    return out_p[:, :, :k]


def reference_forward(x_nchw, cluster_weights, bn_gamma, bn_beta):
    """Pure-JAX f32 mirror of the PyTorch forward (training-mode BN)."""
    b, c, h, w = x_nchw.shape
    n = w * h
    x = jnp.transpose(x_nchw, (0, 3, 2, 1)).reshape(b, n, c).astype(jnp.float32)
    act = jnp.matmul(x, cluster_weights)                      # (B, N, K)
    flat = act.reshape(-1, act.shape[-1])
    mean = jnp.mean(flat, axis=0)
    var = jnp.mean((flat - mean) ** 2, axis=0)
    flat = (flat - mean) / jnp.sqrt(var + BN_EPS) * bn_gamma + bn_beta
    act = jax.nn.softmax(flat.reshape(b, n, -1), axis=-1)
    vlad = jnp.matmul(jnp.swapaxes(act, 2, 1), x)             # (B, K, D)
    return jnp.swapaxes(vlad, 2, 1)                           # (B, D, K)


if __name__ == "__main__":
    # feature_size = C = 16, max_samples = H*W = 64, cluster_size = 32
    B, C, H, W = 2, 16, 8, 8
    cluster_size = 32

    key = jax.random.PRNGKey(0)
    kx, kw = jax.random.split(key)
    x = jax.random.normal(kx, (B, C, H, W), dtype=jnp.float32)

    # cluster_weights ~ randn(feature_size, cluster_size) / sqrt(feature_size)
    cluster_weights = (
        jax.random.normal(kw, (C, cluster_size), dtype=jnp.float32)
        / math.sqrt(C)
    )
    # BatchNorm1d default affine init
    bn_gamma = jnp.ones((cluster_size,), dtype=jnp.float32)
    bn_beta = jnp.zeros((cluster_size,), dtype=jnp.float32)

    out = netvlad_loupe_gem(x, cluster_weights, bn_gamma, bn_beta)
    out = jax.block_until_ready(out)

    ref = reference_forward(x, cluster_weights, bn_gamma, bn_beta)
    assert out.shape == (B, C, cluster_size), out.shape
    max_err = float(jnp.max(jnp.abs(out - ref)))
    # bf16 matmul operands / folded BN scale / (optional) bf16 exp vs f32 reference
    assert jnp.allclose(out, ref, atol=3e-2, rtol=3e-2), max_err
    print("KERNEL_OK")
</pallas_src>

<mosaic_0001>
module attributes {stable_mosaic.version = 11 : i64} {
  func.func @_bn_stats_kernel(%arg0: i32, %arg1: i32, %arg2: memref<1x16x64xf32, #tpu.memory_space<vmem>>, %arg3: memref<16x128xbf16, #tpu.memory_space<vmem>>, %arg4: memref<1x2x128xf32, #tpu.memory_space<vmem>>) attributes {dimension_semantics = [#tpu.dimension_semantics<parallel>, #tpu.dimension_semantics<arbitrary>], iteration_bounds = array<i64: 2, 1>, scalar_prefetch = 0 : i64, scratch_operands = 0 : i64, tpu.core_type = #tpu.core_type<tc>, window_params = [{transform_indices = @transform_0, window_bounds = array<i64: 1, 16, 64>}, {pipeline_mode = #tpu.pipeline_mode<synchronous>, transform_indices = @transform_1, window_bounds = array<i64: 16, 128>}, {transform_indices = @transform_2, window_bounds = array<i64: 1, 2, 128>}]} {
    %c0 = arith.constant 0 : index
    %c0_0 = arith.constant 0 : index
    %c0_1 = arith.constant 0 : index
    %0 = vector.load %arg2[%c0, %c0_0, %c0_1] : memref<1x16x64xf32, #tpu.memory_space<vmem>>, vector<1x16x64xf32>
    %1 = vector.shape_cast %0 : vector<1x16x64xf32> to vector<16x64xf32>
    %2 = arith.truncf %1 : vector<16x64xf32> to vector<16x64xbf16>
    %c0_2 = arith.constant 0 : index
    %c0_3 = arith.constant 0 : index
    %3 = vector.load %arg3[%c0_2, %c0_3] : memref<16x128xbf16, #tpu.memory_space<vmem>>, vector<16x128xbf16>
    %cst = arith.constant dense<0.000000e+00> : vector<64x128xf32>
    %4 = tpu.matmul %2, %3, %cst {dimension_numbers = #tpu.dot_dimension_numbers<[0], [0], [1], [1], [0, 1, 1, 1], [], []>} : vector<16x64xbf16>, vector<16x128xbf16>, vector<64x128xf32> -> vector<64x128xf32>
    %cst_4 = arith.constant dense<0.000000e+00> : vector<128xf32>
    %5 = vector.multi_reduction <add>, %4, %cst_4 [0] : vector<64x128xf32> to vector<128xf32>
    %6 = vector.shape_cast %5 : vector<128xf32> to vector<1x128xf32>
    %7 = vector.shape_cast %6 : vector<1x128xf32> to vector<1x1x128xf32>
    %8 = arith.mulf %4, %4 : vector<64x128xf32>
    %cst_5 = arith.constant dense<0.000000e+00> : vector<128xf32>
    %9 = vector.multi_reduction <add>, %8, %cst_5 [0] : vector<64x128xf32> to vector<128xf32>
    %10 = vector.shape_cast %9 : vector<128xf32> to vector<1x128xf32>
    %11 = vector.shape_cast %10 : vector<1x128xf32> to vector<1x1x128xf32>
    %c0_i32 = arith.constant 0 : i32
    %12 = arith.cmpi eq, %arg1, %c0_i32 : i32
    %13 = arith.extui %12 : i1 to i32
    %c0_i32_6 = arith.constant 0 : i32
    %14 = arith.cmpi ne, %13, %c0_i32_6 : i32
    scf.if %14 {
      %c0_9 = arith.constant 0 : index
      %c0_10 = arith.constant 0 : index
      %c0_11 = arith.constant 0 : index
      %18 = vector.load %arg4[%c0_9, %c0_10, %c0_11] : memref<1x2x128xf32, #tpu.memory_space<vmem>>, vector<1x1x128xf32>
      tpu.vector_store %arg4[%c0_9, %c0_10, %c0_11], %7 {strides = array<i32>} : memref<1x2x128xf32, #tpu.memory_space<vmem>>, vector<1x1x128xf32>,
      %c0_12 = arith.constant 0 : index
      %c1 = arith.constant 1 : index
      %c0_13 = arith.constant 0 : index
      %19 = vector.load %arg4[%c0_12, %c1, %c0_13] : memref<1x2x128xf32, #tpu.memory_space<vmem>>, vector<1x1x128xf32>
      tpu.vector_store %arg4[%c0_12, %c1, %c0_13], %11 {strides = array<i32>} : memref<1x2x128xf32, #tpu.memory_space<vmem>>, vector<1x1x128xf32>,
    } else {
    }
    %c0_i32_7 = arith.constant 0 : i32
    %15 = arith.cmpi ne, %arg1, %c0_i32_7 : i32
    %16 = arith.extui %15 : i1 to i32
    %c0_i32_8 = arith.constant 0 : i32
    %17 = arith.cmpi ne, %16, %c0_i32_8 : i32
    scf.if %17 {
      %c0_9 = arith.constant 0 : index
      %c0_10 = arith.constant 0 : index
      %c0_11 = arith.constant 0 : index
      %18 = vector.load %arg4[%c0_9, %c0_10, %c0_11] : memref<1x2x128xf32, #tpu.memory_space<vmem>>, vector<1x1x128xf32>
      %19 = arith.addf %18, %7 : vector<1x1x128xf32>
      %c0_12 = arith.constant 0 : index
      %c0_13 = arith.constant 0 : index
      %c0_14 = arith.constant 0 : index
      %20 = vector.load %arg4[%c0_12, %c0_13, %c0_14] : memref<1x2x128xf32, #tpu.memory_space<vmem>>, vector<1x1x128xf32>
      tpu.vector_store %arg4[%c0_12, %c0_13, %c0_14], %19 {strides = array<i32>} : memref<1x2x128xf32, #tpu.memory_space<vmem>>, vector<1x1x128xf32>,
      %c0_15 = arith.constant 0 : index
      %c1 = arith.constant 1 : index
      %c0_16 = arith.constant 0 : index
      %21 = vector.load %arg4[%c0_15, %c1, %c0_16] : memref<1x2x128xf32, #tpu.memory_space<vmem>>, vector<1x1x128xf32>
      %22 = arith.addf %21, %11 : vector<1x1x128xf32>
      %c0_17 = arith.constant 0 : index
      %c1_18 = arith.constant 1 : index
      %c0_19 = arith.constant 0 : index
      %23 = vector.load %arg4[%c0_17, %c1_18, %c0_19] : memref<1x2x128xf32, #tpu.memory_space<vmem>>, vector<1x1x128xf32>
      tpu.vector_store %arg4[%c0_17, %c1_18, %c0_19], %22 {strides = array<i32>} : memref<1x2x128xf32, #tpu.memory_space<vmem>>, vector<1x1x128xf32>,
    } else {
    }
    return
  }
  func.func @transform_0(%arg0: i32, %arg1: i32) -> (i32, i32, i32) {
    %c0_i32 = arith.constant 0 : i32
    %c0_i32_0 = arith.constant 0 : i32
    return %arg0, %c0_i32, %arg1 : i32, i32, i32
  }
  func.func @transform_1(%arg0: i32, %arg1: i32) -> (i32, i32) {
    %c0_i32 = arith.constant 0 : i32
    %c0_i32_0 = arith.constant 0 : i32
    %c0_i32_1 = arith.constant 0 : i32
    return %c0_i32, %c0_i32_0 : i32, i32
  }
  func.func @transform_2(%arg0: i32, %arg1: i32) -> (i32, i32, i32) {
    %c0_i32 = arith.constant 0 : i32
    %c0_i32_0 = arith.constant 0 : i32
    %c0_i32_1 = arith.constant 0 : i32
    return %arg0, %c0_i32, %c0_i32_0 : i32, i32, i32
  }
}

</mosaic_0001>

<bundles_post_ra>
// kernel: tpu_custom_call.1
= control target key start
LH: loop header
LB: loop body
LE: loop exit
PB: predicated region body
PF: predicated region fallthrough
CT: control target
= control target key end

     0   :  { %7 = vsyncpa [#allocation3], 0  ;;  %s956_s0 = inlined_call_operand.hbm [shape: f32[2,16,64], index: 0, kind: input, shape index: {}]   ;;  %s957_s1 = inlined_call_operand.hbm [shape: bf16[16,128], index: 1, kind: input, shape index: {}]   ;;  %s958_s2 = inlined_call_operand.hbm [shape: f32[2,2,128], index: 2, kind: output, shape index: {}]  }
   0x1   :  { %9 = vsyncpa [#allocation3 + $0x1], 0 }
   0x2   :  { %10 = vsyncpa [#allocation6], 0 }
   0x3   :  { %11 = vsyncpa [#allocation4], 0 }
   0x4   :  { %13 = vsyncpa [#allocation4 + $0x1], 0  ;;  %s738_s9 = smov 0   ;;  %s740_s10 = smov 0  }
   0x5   :  { %s742_s11 = smov 0   ;;  %s744_s12 = smov 0  }
   0x6   :  { %s746_s13 = smov 0   ;;  %s748_s14 = smov 0  }
   0x7 LB: > { %s452_s15 = sadd.s32 4294967295, %s714_s14   ;;  %s453_s16 = sadd.s32 4294967294, %s714_s14   ;;  %s714_s14 = sphi %s748_s14, %s19_s14   ;;  %s710_s13 = sphi %s746_s13, %s982_s13   ;;  %s706_s12 = sphi %s744_s12, %s981_s12   ;;  %s702_s11 = sphi %s742_s11, %s980_s11   ;;  %s698_s10 = sphi %s740_s10, %s979_s10   ;;  %s694_s9 = sphi %s738_s9, %s978_s9  }
   0x8   : > { %p53_p0 = scmp.ne.s32.totalorder %s698_s10, %s694_s9  ;;  %p772_p1 = scmp.eq.s32.totalorder %s452_s15, 0 }
   0x9   : > { %p776_p2 = scmp.eq.s32.totalorder %s452_s15, 1  ;;  %p104_p3 = scmp.eq.s32.totalorder %s453_s16, 1 }
   0xa   : > { %s963_s17 = scalar_select %p772_p1, 1, 0 }
   0xb   : > { %s964_s18 = scalar_select %p776_p2, 1, 0 }
   0xc   : > { %p782_p4 = por %p772_p1, %p53_p0  ;;  %p454_p5 = scmp.ge.s32.totalorder %s714_s14, 1 }
   0xd   : > { %p787_p6 = por %p104_p3, %p53_p0  ;;  %p111_p7 = scmp.lt.s32.totalorder %s714_s14, 3 }
   0xe   : > { %s965_s19 = scalar_select %p782_p4, 1, 0 }
   0xf   : > { %s966_s20 = scalar_select %p787_p6, 1, 0 }
  0x10   : > { %p792_p8 = pnand %p454_p5, %p111_p7  ;;  %s716_s22 = smov [#allocation5]  }
  0x11   : > { %s123_s23 = sshll.u32 %s716_s22, 4  ;;  %s31_s25 = sadd.s32 1, %s710_s13  ;;  %s124_s23 = int_to_ptr.vmem [resolvable:$true] %s123_s23 }
  0x12   : > { %s967_s21 = scalar_select %p792_p8, 1, 0 }
  0x13   : > { %p499_p9 = pneg %p792_p8  ;;  %s570_s28 = scalar_lea.hbm %s957_s1, 128 }
  0x14   : > { %p571_p12 = scmp.ne.s32.totalorder %s957_s1, %s570_s28  ;;  %p577_p5 = scmp.lt.u32.totalorder %s570_s28, %s957_s1 }
  0x15   : > { %p801_p11 = pnand %p499_p9, %p772_p1 }
  0x17   : > { %p572_p13 = pneg %p801_p11 }
  0x19   : > { %p573_p0 = pnand %p572_p13, %p571_p12 }
  0x1b   : > { %p574_p3 = pneg %p573_p0 }
  0x1d   : > { %p579_p7 = pnand %p577_p5, %p574_p3 }
  0x1f   : > { %582 = shalt.err (!%p579_p7)
}
  0x20   : > { %s583_s5 = scalar_lea.vmem %s124_s23, 128  ;;  %p591_p1 = scmp.lt.s32.totalorder %s124_s23, %s124_s23 }
  0x21   : > { %p584_p9 = scmp.ne.s32.totalorder %s124_s23, %s583_s5  ;;  %p592_p4 = scmp.lt.s32.totalorder %s583_s5, %s583_s5 }
  0x23   : > { %p586_p10 = pnand %p584_p9, %p572_p13  ;;  %p593_p8 = por %p592_p4, %p591_p1 }
  0x25   : > { %p587_p6 = pneg %p586_p10 }
  0x27   : > { %p594_p2 = pnand %p593_p8, %p587_p6 }
  0x29   : > { %597 = shalt.err (!%p594_p2)
}
  0x2a   : > { %s717_s6 = smov 64   ;;  %s718_s7 = smov 4  }
  0x2b   : > { %502 = dma.hbm_to_vmem [thread:$0]  (!%p801_p11), %s957_s1, 128, %s124_s23, [#allocation6], %s717_s6, %s717_s6, %s718_s7  }
  0x2c   : > { %p33_p1 = scmp.ge.s32.totalorder %s31_s25, 2  ;;  %s40_s16 = sadd.s32 1, %s702_s11 }
  0x2d   : > { %p47_p2 = scmp.ne.s32.totalorder %s702_s11, %s698_s10  ;;  %p48_p4 = scmp.eq.s32.totalorder %s714_s14, 0 }
  0x2e   : > { %s984_s25 = smov (%p33_p1, %s31_s25), 0  ;;  %p970_p8 = scmp.ne.s32.totalorder %s964_s18, 0 }
  0x2f   : > { %p828_p6 = por %p48_p4, %p47_p2  ;;  %s35_s24 = ssub.s32 %s710_s13, %s984_s25 }
  0x30   : > { %p834_p10 = por %p970_p8, %p47_p2  ;;  %p512_p12 = scmp.lt.s32.totalorder %s714_s14, 2 }
  0x31   : > { %p38_p11 = scmp.eq.s32.totalorder %s35_s24, 0  ;;  %s137_s23 = sand.u32 1, %s702_s11  }
  0x32   : > { %s457_s27 = sshll.u32 %s137_s23, 4  ;;  %s473_s29 = sshll.u32 %s710_s13, 8 }
  0x33   : > { %s843_s28 = scalar_select %p38_p11, %s702_s11, %s40_s16  }
  0x34   : > { %s849_s4 = scalar_lea.hbm %s956_s0, %s473_s29  ;;  %s141_s18 = scalar_lea.vmem [#allocation2], %s457_s27 }
  0x35   : > { %s149_s5 = sshll.u32 %s141_s18, 4  ;;  %p855_p13 = pnand %p512_p12, %p828_p6  ;;  %s851_s5 = int_to_ptr.vmem [resolvable:$true] %s149_s5 }
  0x36   : > { %s859_s7 = scalar_lea.sflag [#allocation3], %s137_s23  ;;  %s598_s8 = scalar_lea.hbm %s849_s4, 256 }
  0x37   : > { %p599_p0 = scmp.ne.s32.totalorder %s849_s4, %s598_s8  ;;  %p600_p3 = pneg %p855_p13 }
  0x38   : > { %s603_s22 = scalar_lea.hbm %s956_s0, 512  ;;  %p604_p9 = scmp.lt.u32.totalorder %s849_s4, %s956_s0 }
  0x39   : > { %p601_p5 = pnand %p600_p3, %p599_p0  ;;  %p605_p1 = scmp.lt.u32.totalorder %s603_s22, %s598_s8 }
  0x3a   : > { %p607_p4 = scmp.lt.u32.totalorder %s598_s8, %s849_s4 }
  0x3b   : > { %p602_p7 = pneg %p601_p5  ;;  %p606_p2 = por %p605_p1, %p604_p9 }
  0x3d   : > { %p608_p6 = por %p607_p4, %p606_p2 }
  0x3f   : > { %p609_p8 = pnand %p608_p6, %p602_p7 }
  0x41   : > { %612 = shalt.err (!%p609_p8)
}
  0x42   : > { %s613_s23 = scalar_lea.vmem %s851_s5, 256  ;;  %s719_s29 = smov [#allocation2]  }
  0x43   : > { %p614_p12 = scmp.ne.s32.totalorder %s851_s5, %s613_s23  ;;  %s618_s30 = sshll.u32 %s719_s29, 4  ;;  %s619_s30 = int_to_ptr.vmem [resolvable:$false] %s618_s30 }
  0x44   : > { %s620_s3 = scalar_lea.vmem %s619_s30, 512  ;;  %p621_p5 = scmp.lt.s32.totalorder %s851_s5, %s619_s30 }
  0x45   : > { %p616_p11 = pnand %p614_p12, %p600_p3  ;;  %p622_p9 = scmp.lt.s32.totalorder %s620_s3, %s613_s23 }
  0x47   : > { %p617_p0 = pneg %p616_p11  ;;  %p623_p1 = por %p622_p9, %p621_p5 }
  0x49   : > { %p624_p2 = pnand %p623_p1, %p617_p0 }
  0x4b   : > { %627 = shalt.err (!%p624_p2)
}
  0x4c   : > { %s720_s18 = smov 128   ;;  %s721_s8 = smov 8  }
  0x4d   : > { %506 = dma.hbm_to_vmem [thread:$0]  (!%p855_p13), %s849_s4, 256, %s851_s5, %s859_s7, %s720_s18, %s720_s18, %s721_s8  }
  0x4e   : > { %p973_p3 = scmp.ne.s32.totalorder %s967_s21, 0 }
  0x4f   : > { %s890_s15 = sand.u32 (!%p973_p3), 1, %s698_s10   ;;  %p974_p7 = scmp.ne.s32.totalorder (!%p973_p3), %s965_s19, 0 }
  0x50   : > { %161 = sbr.rel (%p973_p3) target bundleno = 458 (0x1ca), region = 28  ;;  %s461_s16 = sshll.u32 (!%p973_p3), %s890_s15, 4 }
  0x51   : > { %s164_s22 = scalar_lea.sflag (!%p973_p3), [#allocation3], %s890_s15  ;;  %s167_s24 = scalar_lea.vmem (!%p973_p3), [#allocation2], %s461_s16 }
  0x57   : > { %681 = dma.done.wait (%p974_p7), %s164_s22, 256  }
  0x58   : > { %683 = vsyncadd (%p974_p7), %s164_s22, 4294967040  ;;  %p975_p4 = scmp.ne.s32.totalorder %s963_s17, 0 }
  0x5a   : > { %685 = dma.done.wait (%p975_p4), [#allocation6], 128  }
  0x5b   : > { %687 = vsyncadd (%p975_p4), [#allocation6], 4294967168  ;;  %v193_v0 = vld [vmem:[%s167_s24] sm:$0xff]  ;;  %v194_v1 = vld [vmem:[%s167_s24 + $0x8] sm:$0xff]  ;;  %vm220_vm0 = vcmask 130048   ;;  %s463_s17 = sshll.u32 %s890_s15, 1 }
  0x5c   : > { %v195_v2 = vpack.c.bf16 %v194_v1, %v193_v0  ;;  %v569_v3 = vld [vmem:[#allocation5] sm:$0xff]   ;;  %s470_s19 = sshll.u32 %s706_s12, 5  ;;  %s191_s21 = scalar_lea.vmem [#allocation7], %s463_s17 }
  0x5d   : > { %479 = vmatprep.subr.bf16.mxu0 %v569_v3  ;;  %489 = vmatprep.subr.bf16.mxu1 %v569_v3  ;;  %s362_s4 = sshll.u32 %s191_s21, 4  ;;  %s907_s7 = scalar_lea.hbm %s958_s2, %s470_s19  ;;  %s909_s4 = int_to_ptr.vmem [resolvable:$true] %s362_s4 }
  0x5e   : > { %198 = vxpose.xlu0.c.b16.start.end [1/1] (short) (narrow) %v195_v2, 64  ;;  %480 = vmatpush3.bf16.msra.mxu0 %v569_v3  ;;  %s349_s27 = scalar_lea.sflag [#allocation4], %s890_s15  ;;  %s628_s23 = scalar_lea.vmem %s909_s4, 32 }
  0x5f   : > { %490 = vmatpush3.bf16.msra.mxu1 %v569_v3  ;;  %p629_p13 = scmp.ne.s32.totalorder %s909_s4, %s628_s23  ;;  %s722_s12 = smov [#allocation7]  }
  0x60   : > { %s632_s29 = sshll.u32 %s722_s12, 4  ;;  %s633_s29 = int_to_ptr.vmem [resolvable:$false] %s632_s29 }
  0x61   : > { %p630_p6 = pnand %p629_p13, %p834_p10  ;;  %s634_s30 = scalar_lea.vmem %s633_s29, 64 }
  0x62   : > { %p635_p12 = scmp.lt.s32.totalorder %s909_s4, %s633_s29  ;;  %p636_p11 = scmp.lt.s32.totalorder %s634_s30, %s628_s23 }
  0x63   : > { %p631_p8 = pneg %p630_p6 }
  0x64   : > { %p637_p0 = por %p636_p11, %p635_p12 }
  0x66   : > { %p638_p5 = pnand %p637_p0, %p631_p8 }
  0xc4   : > { %v206_v4 = vpop.trf.xlu0 }
  0xc5   : > { %481 = vmatprep.mubr.msk.bf16.mxu0 %vm220_vm0, %v206_v4 }
  0xc8   : > { %v207_v5 = vpop.trf.xlu0 }
  0xc9   : > { %482 = vmatmul.mubr.msk.bf16.vlgmr.msra.gmra.mrb[0].mxu0 %vm220_vm0, %v207_v5 }
  0xcc   : > { %v208_v6 = vpop.trf.xlu0 }
  0xcd   : > { %485 = vmatprep.mubr.msk.bf16.mxu1 %vm220_vm0, %v208_v6 }
  0xd0   : > { %v209_v7 = vpop.trf.xlu0 }
  0xd1   : > { %486 = vmatmul.mubr.msk.bf16.vlgmr.msra.gmra.mrb[0].mxu1 %vm220_vm0, %v209_v7 }
 0x19c   : > { %v483_v8 = vpop.f32.mrb[0].mxu0 }
 0x19d   : > { %v267_v9 = vpop.f32.mrb[1].mxu0  ;;  %v313_v15 = vmul.f32 %v483_v8, %v483_v8 }
 0x19e   : > { %v484_v10 = vpop.f32.mrb[2].mxu0  ;;  %v311_v12 = vmul.f32 %v267_v9, %v267_v9 }
 0x19f   : > { %v270_v11 = vpop.f32.mrb[3].mxu0  ;;  %v314_v18 = vmul.f32 %v484_v10, %v484_v10 }
 0x1a0   : > { %v298_v13 = vadd.f32 %v270_v11, %v267_v9  ;;  %v312_v14 = vmul.f32 %v270_v11, %v270_v11 }
 0x1a2   : > { %v299_v16 = vadd.f32 %v483_v8, %v298_v13  ;;  %v319_v17 = vadd.f32 %v312_v14, %v311_v12 }
 0x1a4   : > { %v320_v19 = vadd.f32 %v319_v17, %v313_v15  ;;  %v487_v20 = vpop.f32.mrb[0].mxu1  ;;  %v300_v21 = vadd.f32 %v484_v10, %v299_v16 }
 0x1a5   : > { %v283_v22 = vpop.f32.mrb[1].mxu1  ;;  %v317_v31 = vmul.f32 %v487_v20, %v487_v20 }
 0x1a6   : > { %v301_v23 = vadd.f32 %v300_v21, %v283_v22  ;;  %v315_v24 = vmul.f32 %v283_v22, %v283_v22  ;;  %v321_v25 = vadd.f32 %v320_v19, %v314_v18  ;;  %v488_v26 = vpop.f32.mrb[2].mxu1 }
 0x1a7   : > { %v286_v27 = vpop.f32.mrb[3].mxu1  ;;  %v318_v34 = vmul.f32 %v488_v26, %v488_v26 }
 0x1a8   : > { %v322_v28 = vadd.f32 %v321_v25, %v315_v24  ;;  %v302_v29 = vadd.f32 %v301_v23, %v286_v27  ;;  %v316_v30 = vmul.f32 %v286_v27, %v286_v27 }
 0x1aa   : > { %v303_v32 = vadd.f32 %v487_v20, %v302_v29  ;;  %v323_v33 = vadd.f32 %v322_v28, %v316_v30 }
 0x1ac   : > { %v304_v35 = vadd.f32 %v488_v26, %v303_v32  ;;  %v324_v36 = vadd.f32 %v323_v33, %v317_v31 }
 0x1ae   : > { %v305_v37 = vrot.slane %v304_v35, 4  ;;  %v325_v38 = vadd.f32 %v324_v36, %v318_v34 }
 0x1b0   : > { %v306_v39 = vadd.f32 %v305_v37, %v304_v35  ;;  %v326_v40 = vrot.slane %v325_v38, 4 }
 0x1b2   : > { %v307_v41 = vrot.slane %v306_v39, 2  ;;  %v327_v42 = vadd.f32 %v326_v40, %v325_v38 }
 0x1b4   : > { %v308_v43 = vadd.f32 %v307_v41, %v306_v39  ;;  %v328_v44 = vrot.slane %v327_v42, 2 }
 0x1b6   : > { %v309_v45 = vrot.slane %v308_v43, 1  ;;  %v329_v46 = vadd.f32 %v328_v44, %v327_v42 }
 0x1b8   : > { %v310_v47 = vadd.f32 %v309_v45, %v308_v43  ;;  %v330_v48 = vrot.slane %v329_v46, 1 }
 0x1ba   : > { %v331_v49 = vadd.f32 %v330_v48, %v329_v46  ;;  %336 = vst [vmem:[%s191_s21] sm:$0x1] %v310_v47 }
 0x1bc   : > { %337 = vst [vmem:[%s191_s21 + $0x1] sm:$0x1] %v331_v49 }
 0x1bd   : > { %641 = shalt.err (!%p638_p5)
}
 0x1be   : > { %s642_s3 = scalar_lea.hbm %s907_s7, 32  ;;  %s646_s15 = scalar_lea.hbm %s958_s2, 64 }
 0x1bf   : > { %p643_p9 = scmp.ne.s32.totalorder %s907_s7, %s642_s3  ;;  %p647_p3 = scmp.lt.u32.totalorder %s907_s7, %s958_s2 }
 0x1c0   : > { %p648_p7 = scmp.lt.u32.totalorder %s646_s15, %s642_s3  ;;  %p650_p13 = scmp.lt.u32.totalorder %s642_s3, %s907_s7 }
 0x1c1   : > { %p644_p1 = pnand %p643_p9, %p834_p10 }
 0x1c2   : > { %p649_p4 = por %p648_p7, %p647_p3 }
 0x1c3   : > { %p645_p2 = pneg %p644_p1 }
 0x1c4   : > { %p651_p6 = por %p650_p13, %p649_p4 }
 0x1c6   : > { %p652_p8 = pnand %p651_p6, %p645_p2 }
 0x1c8   : > { %655 = shalt.err (!%p652_p8)
}
 0x1c9   : > { %497 = dma.vmem_to_hbm [thread:$0]  (%p834_p10), %s909_s4, 32, %s907_s7, %s349_s27  }
 0x1ca PF: > { %s374_s24 = sand.u32 1, %s694_s9   ;;  %p976_p12 = scmp.ne.s32.totalorder %s966_s20, 0 }
 0x1cb   : > { %p977_p11 = scmp.ge.s32.totalorder %s714_s14, 2  ;;  %s375_s17 = scalar_lea.sflag [#allocation4], %s374_s24 }
 0x1cd   : > { %p508_p0 = pnand %p977_p11, %p976_p12 }
 0x1cf   : > { %689 = dma.done.wait (!%p508_p0), %s375_s17, 32  }
 0x1d0   : > { %691 = vsyncadd (!%p508_p0), %s375_s17, 4294967264  ;;  %s19_s14 = sadd.s32 1, %s714_s14   ;;  %s978_s9 = smov %s698_s10 }
 0x1d1   : > { %p16_p5 = scmp.ge.s32.totalorder %s19_s14, 4   ;;  %s979_s10 = smov %s702_s11 }
 0x1d2   : > { %s980_s11 = smov %s843_s28  ;;  %s981_s12 = smov %s710_s13 }
 0x1d3   : > { %s982_s13 = smov %s984_s25  ;;  %18 = sbr.rel (!%p16_p5) target bundleno = 7 (0x7), region = 85 }
 0x1da   :  { %380 = vsyncpa [#allocation3], 1 }
 0x1db   :  { %382 = vsyncpa [#allocation3 + $0x1], 1 }
 0x1dc   :  { %383 = vsyncpa [#allocation6], 1 }
 0x1dd   :  { %384 = vsyncpa [#allocation4], 1 }
 0x1de   :  { %386 = vsyncpa [#allocation4 + $0x1], 1 }

</bundles_post_ra>
